<compile_context>
chip_gen: v7x
topology: tpu7x:2x2x1
jax: 0.10.0
libtpu: 0.0.40
codegen_flags: <defaults>
</compile_context>

<pallas_src>
import math

import jax
import jax.numpy as jnp
from jax.experimental import pallas as pl
from jax.experimental.pallas import tpu as pltpu


_LANE = 128                           # vreg lane width
_BLOCK_BYTE_BUDGET = 4 * 1024 * 1024  # per x block (output block is similar size)
_TARGET_GRID_STEPS = 4                # keep >=4 grid steps so megacore can shard
_PALLAS_MIN_ELEMS = 1 << 21           # below this, plain jnp / XLA fusion wins


def _scale_bias_kernel(scale_ref, bias_ref, x_ref, o_ref):
    # scale_ref: SMEM f32[1]          (scalar parameter)
    # bias_ref : VMEM f32[1, LW]      (resident: index_map always (0, 0))
    # x_ref    : VMEM x.dtype[TB, LW]
    # o_ref    : VMEM out.dtype[TB, LW]  (lane-dense: LW % 128 == 0)
    xf = x_ref[...].astype(jnp.float32)
    o_ref[...] = (scale_ref[0] * xf + bias_ref[...]).astype(o_ref.dtype)


def _round_up(a, b):
    return (a + b - 1) // b * b


def scale_bias_forward(x, scale, bias, *, block_rows=None, out_dtype=None,
                       donate_x=False):
    """Pallas forward: scale * x + bias.  x: [B, C]; scale: scalar; bias: [C]."""
    B, C = x.shape
    x_dtype = jnp.dtype(x.dtype)
    out_dtype = x_dtype if out_dtype is None else jnp.dtype(out_dtype)
    x_itemsize = x_dtype.itemsize
    o_itemsize = out_dtype.itemsize

    # Sublane multiple for the row tile (8 for 4B, 16 for 2B, 32 for 1B dtypes).
    sub = max(8, 32 // x_itemsize, 32 // o_itemsize)

    # ---- lane-dense folding of the batch axis -------------------------------
    R = _LANE // math.gcd(C, _LANE)   # batch rows folded per slab row
    LW = R * C                        # lane width, multiple of 128

    # Pad only to a multiple of R (needed for the reshape); usually a no-op.
    if B % R:
        x = jnp.pad(x, ((0, R - B % R), (0, 0)))
    padded_B = x.shape[0]
    nrows = padded_B // R
    x2d = x.reshape(nrows, LW)        # free, row-major bitcast

    scale_arr = jnp.asarray(scale, jnp.float32).reshape((1,))
    bias_row = jnp.tile(jnp.asarray(bias, jnp.float32).reshape((C,)), R).reshape(1, LW)

    # ---- row tile: VMEM-budgeted, but keep >= _TARGET_GRID_STEPS steps ------
    row_bytes = LW * x_itemsize
    tb_budget = max(sub, (_BLOCK_BYTE_BUDGET // row_bytes) // sub * sub)
    if block_rows is not None:
        TB = max(sub, _round_up(block_rows, sub))
    else:
        target = max(sub, _round_up(pl.cdiv(nrows, _TARGET_GRID_STEPS), sub))
        TB = min(tb_budget, target)
    if TB >= nrows:
        TB = nrows                    # single full-extent block (always legal)
    grid = (pl.cdiv(nrows, TB),)      # ragged last block handled by Pallas

    # Explicit VMEM limit with headroom over the double-buffered blocks.
    x_blk = TB * LW * x_itemsize
    o_blk = TB * LW * o_itemsize
    vmem_needed = 2 * (x_blk + o_blk) + LW * 4 + (2 << 20)
    vmem_limit = int(max(vmem_needed, 32 << 20))
    # TODO(synk): for very wide LW (large odd nr_classes) vmem_needed can exceed
    # v7x's 64 MiB physical VMEM; fall back to an unfolded [B, C] layout there.

    extra = {}
    if donate_x and out_dtype == x_dtype:
        extra["input_output_aliases"] = {2: 0}   # alias x slab to the output

    out2d = pl.pallas_call(
        _scale_bias_kernel,
        out_shape=jax.ShapeDtypeStruct((nrows, LW), out_dtype),
        grid=grid,
        in_specs=[
            pl.BlockSpec(memory_space=pltpu.SMEM),        # scale (scalar)
            pl.BlockSpec((1, LW), lambda i: (0, 0)),      # bias row, stays resident
            pl.BlockSpec((TB, LW), lambda i: (i, 0)),     # x tile (double-buffered)
        ],
        out_specs=pl.BlockSpec((TB, LW), lambda i: (i, 0)),
        compiler_params=pltpu.CompilerParams(
            dimension_semantics=("parallel",),            # shard tiles across TCs (v7x)
            vmem_limit_bytes=vmem_limit,
        ),
        **extra,
    )(scale_arr, bias_row, x2d)

    out = out2d.reshape(padded_B, C)
    if padded_B != B:                 # only when B % R != 0
        out = out[:B]
    return out


class ScaleBias:
    """JAX mirror of the PyTorch ScaleBias module (forward only)."""

    def __init__(self, nr_classes):
        self.nr_classes = nr_classes
        # Deterministic init matching the PyTorch __init__:
        self.scale = jnp.asarray(1.0 / nr_classes, jnp.float32)
        self.bias = jnp.zeros((nr_classes,), jnp.float32)

    def __call__(self, x):
        # Classifier-head sized inputs: let XLA fuse the affine op for free.
        if x.size < _PALLAS_MIN_ELEMS:
            return self.scale * x + self.bias.reshape(-1, self.nr_classes)
        return scale_bias_forward(x, self.scale, self.bias)

    def get_scale_bias_eval(self):
        return (self.scale, self.bias)


if __name__ == "__main__":
    nr_classes = 10
    batch = 8

    key = jax.random.PRNGKey(0)
    kx, kb, kbig = jax.random.split(key, 3)
    x_small = jax.random.normal(kx, (batch, nr_classes), dtype=jnp.float32)

    mod = ScaleBias(nr_classes)
    # Non-zero bias so the broadcast path is actually exercised.
    mod.bias = 0.1 * jax.random.normal(kb, (nr_classes,), dtype=jnp.float32)

    def ref(x):
        return mod.scale * x.astype(jnp.float32) + mod.bias.reshape(-1, nr_classes)

    # 1) Pallas kernel at the module's natural small shape (B % R != 0 path).
    out_small = jax.block_until_ready(
        scale_bias_forward(x_small, mod.scale, mod.bias))
    assert out_small.shape == (batch, nr_classes)
    assert jnp.allclose(out_small, ref(x_small), atol=1e-6, rtol=1e-6)

    # 2) Forced small row tile -> multi-step grid (pipelining path), no padding.
    x_big = jax.random.normal(kbig, (2048, nr_classes), dtype=jnp.float32)
    out_big = jax.block_until_ready(
        scale_bias_forward(x_big, mod.scale, mod.bias, block_rows=8))
    assert jnp.allclose(out_big, ref(x_big), atol=1e-6, rtol=1e-6)

    # 3) Dtype-preserving path: bf16 in -> bf16 out, f32 math inside the kernel.
    x_bf16 = x_big.astype(jnp.bfloat16)
    out_bf16 = jax.block_until_ready(
        scale_bias_forward(x_bf16, mod.scale, mod.bias))
    assert out_bf16.dtype == jnp.bfloat16
    assert jnp.allclose(out_bf16.astype(jnp.float32),
                        ref(x_bf16), atol=1e-2, rtol=1e-2)

    # 4) Module dispatch (tiny input takes the plain-jnp fast path).
    out_mod = jax.block_until_ready(mod(x_small))
    assert jnp.allclose(out_mod, ref(x_small), atol=1e-6, rtol=1e-6)

    print("KERNEL_OK")
</pallas_src>

<mosaic_0001>
module attributes {stable_mosaic.version = 11 : i64} {
  func.func @_scale_bias_kernel(%arg0: i32, %arg1: memref<1xf32, #tpu.memory_space<smem>>, %arg2: memref<1x640xf32, #tpu.memory_space<vmem>>, %arg3: memref<1x640xf32, #tpu.memory_space<vmem>>, %arg4: memref<1x640xf32, #tpu.memory_space<vmem>>) attributes {dimension_semantics = [#tpu.dimension_semantics<parallel>], iteration_bounds = array<i64: 1>, scalar_prefetch = 0 : i64, scratch_operands = 0 : i64, tpu.core_type = #tpu.core_type<tc>, window_params = [{transform_indices = @transform_0, window_bounds = array<i64: 1>}, {pipeline_mode = #tpu.pipeline_mode<synchronous>, transform_indices = @transform_1, window_bounds = array<i64: 1, 640>}, {transform_indices = @transform_2, window_bounds = array<i64: 1, 640>}, {transform_indices = @transform_3, window_bounds = array<i64: 1, 640>}]} {
    %c0 = arith.constant 0 : index
    %c0_0 = arith.constant 0 : index
    %0 = vector.load %arg3[%c0, %c0_0] : memref<1x640xf32, #tpu.memory_space<vmem>>, vector<1x640xf32>
    %c0_1 = arith.constant 0 : index
    %1 = memref.load %arg1[%c0_1] : memref<1xf32, #tpu.memory_space<smem>>
    %2 = vector.broadcast %1 : f32 to vector<1x640xf32>
    %3 = arith.mulf %2, %0 : vector<1x640xf32>
    %c0_2 = arith.constant 0 : index
    %c0_3 = arith.constant 0 : index
    %4 = vector.load %arg2[%c0_2, %c0_3] : memref<1x640xf32, #tpu.memory_space<vmem>>, vector<1x640xf32>
    %5 = arith.addf %3, %4 : vector<1x640xf32>
    %c0_4 = arith.constant 0 : index
    %c0_5 = arith.constant 0 : index
    %6 = vector.load %arg4[%c0_4, %c0_5] : memref<1x640xf32, #tpu.memory_space<vmem>>, vector<1x640xf32>
    tpu.vector_store %arg4[%c0_4, %c0_5], %5 {strides = array<i32>} : memref<1x640xf32, #tpu.memory_space<vmem>>, vector<1x640xf32>,
    return
  }
  func.func @transform_0(%arg0: i32) -> i32 {
    %c0_i32 = arith.constant 0 : i32
    %c0_i32_0 = arith.constant 0 : i32
    return %c0_i32 : i32
  }
  func.func @transform_1(%arg0: i32) -> (i32, i32) {
    %c0_i32 = arith.constant 0 : i32
    %c0_i32_0 = arith.constant 0 : i32
    %c0_i32_1 = arith.constant 0 : i32
    return %c0_i32, %c0_i32_0 : i32, i32
  }
  func.func @transform_2(%arg0: i32) -> (i32, i32) {
    %c0_i32 = arith.constant 0 : i32
    %c0_i32_0 = arith.constant 0 : i32
    return %arg0, %c0_i32 : i32, i32
  }
  func.func @transform_3(%arg0: i32) -> (i32, i32) {
    %c0_i32 = arith.constant 0 : i32
    %c0_i32_0 = arith.constant 0 : i32
    return %arg0, %c0_i32 : i32, i32
  }
}

</mosaic_0001>

<bundles_post_ra>
// kernel: tpu_custom_call.1
= control target key start
LH: loop header
LB: loop body
LE: loop exit
PB: predicated region body
PF: predicated region fallthrough
CT: control target
= control target key end

     0   :  { %9 = vsyncpa [#allocation4], 0  ;;  %s156_s0 = inlined_call_operand.<no memory space> [shape: f32[1], index: 0, kind: input, shape index: {}]   ;;  %s157_s1 = inlined_call_operand.hbm [shape: f32[1,640], index: 1, kind: input, shape index: {}]   ;;  %s158_s2 = inlined_call_operand.vmem [shape: f32[1,640], index: 2, kind: input, shape index: {}]   ;;  %s159_s3 = inlined_call_operand.hbm [shape: f32[1,640], index: 3, kind: output, shape index: {}]  }
   0x1   :  { %10 = vsyncpa [#allocation5], 0  ;;  %s104_s12 = smov [#allocation3]   ;;  %s56_s16 = scalar_lea.hbm %s157_s1, 80 }
   0x2   :  { %s19_s13 = sshll.u32 %s104_s12, 4  ;;  %p57_p0 = scmp.ne.s32.totalorder %s157_s1, %s56_s16  ;;  %s20_s13 = int_to_ptr.vmem [resolvable:$true] %s19_s13 }
   0x3   :  { %p60_p1 = scmp.lt.u32.totalorder %s56_s16, %s157_s1 }
   0x5   :  { %p62_p2 = pnand %p60_p1, %p57_p0 }
   0x7   :  { %65 = shalt.err (!%p62_p2)
}
   0x8   :  { %s66_s21 = scalar_lea.vmem %s20_s13, 80  ;;  %s70_s22 = scalar_lea.vmem %s20_s13, 96 }
   0x9   :  { %p67_p3 = scmp.ne.s32.totalorder %s20_s13, %s66_s21  ;;  %p71_p4 = scmp.lt.s32.totalorder %s20_s13, %s20_s13 }
   0xa   :  { %p72_p5 = scmp.lt.s32.totalorder %s70_s22, %s66_s21 }
   0xc   :  { %p73_p6 = por %p72_p5, %p71_p4 }
   0xe   :  { %p74_p7 = pnand %p73_p6, %p67_p3 }
  0x10   :  { %77 = shalt.err (!%p74_p7)
}
  0x11   :  { %22 = dma.hbm_to_vmem [thread:$0]  %s157_s1, 80, %s20_s13, [#allocation4]  }
  0x12   :  { %100 = dma.done.wait [#allocation4], 80  }
  0x13   :  { %101 = vsyncadd [#allocation4], 4294967216  ;;  %v30_v0 = vstv %s156_s0  ;;  %v34_v1 = vlaneseq  ;;  %v28_v2 = vld [vmem:[%s158_s2] sm:$0x1f]  ;;  %s105_s29 = smov [#allocation6]  }
  0x14   :  { %v32_v3 = vld [vmem:[#allocation3] sm:$0x1f]  ;;  %s45_s30 = sshll.u32 %s105_s29, 4  ;;  %v31_v4 = vmul.f32 %v30_v0, %v28_v2  ;;  %s46_s30 = int_to_ptr.vmem [resolvable:$true] %s45_s30 }
  0x15   :  { %vm36_vm0 = vcmp.lt.s32.totalorder %v34_v1, 640  ;;  %s78_s1 = scalar_lea.vmem %s46_s30, 80  ;;  %s82_s4 = scalar_lea.vmem %s46_s30, 96 }
  0x16   :  { %v33_v5 = vadd.f32 %v32_v3, %v31_v4  ;;  %p79_p8 = scmp.ne.s32.totalorder %s46_s30, %s78_s1  ;;  %p83_p9 = scmp.lt.s32.totalorder %s46_s30, %s46_s30 }
  0x17   :  { %p84_p10 = scmp.lt.s32.totalorder %s82_s4, %s78_s1 }
  0x18   :  { %38 = vst.msk [vmem:[#allocation6] sm:$0x1f] %vm36_vm0, %v33_v5 }
  0x19   :  { %p85_p11 = por %p84_p10, %p83_p9 }
  0x1b   :  { %p86_p12 = pnand %p85_p11, %p79_p8 }
  0x1d   :  { %89 = shalt.err (!%p86_p12)
}
  0x1e   :  { %s90_s2 = scalar_lea.hbm %s159_s3, 80 }
  0x1f   :  { %p91_p13 = scmp.ne.s32.totalorder %s159_s3, %s90_s2  ;;  %p94_p0 = scmp.lt.u32.totalorder %s90_s2, %s159_s3 }
  0x21   :  { %p96_p1 = pnand %p94_p0, %p91_p13 }
  0x23   :  { %99 = shalt.err (!%p96_p1)
}
  0x24   :  { %48 = dma.vmem_to_hbm [thread:$0]  %s46_s30, 80, %s159_s3, [#allocation5]  }
  0x25   :  { %102 = dma.done.wait [#allocation5], 80  }
  0x26   :  { %103 = vsyncadd [#allocation5], 4294967216 }
  0x27   :  { %52 = vsyncpa [#allocation4], 1 }
  0x28   :  { %53 = vsyncpa [#allocation5], 1 }

</bundles_post_ra>
